<compile_context>
chip_gen: v6e
topology: v6e:2x2x1
jax: 0.10.0
libtpu: 0.0.40
codegen_flags: <defaults>
</compile_context>

<pallas_src>
import functools

import numpy as np
import jax
import jax.numpy as jnp
from jax.experimental import pallas as pl
from jax.experimental.pallas import tpu as pltpu

# Kinetics normalization constants (the repo's DEFAULT_MEAN / DEFAULT_STD)
DEFAULT_MEAN = (0.43216, 0.394666, 0.37645)
DEFAULT_STD = (0.22803, 0.22145, 0.216989)


def _perturb_kernel(x_ref, p_ref, o_ref, *, inv_std, max_norm, min_value, max_value):
    """Elementwise hot path: clamp -> per-channel normalize -> add -> clip.

    x_ref : (1, C, T_tile, HW_tile) VMEM tile of the input video
    p_ref : (C, T_tile, HW_tile)    VMEM tile of the perturbation (reused across batch)
    o_ref : (1, C, T_tile, HW_tile) VMEM output tile
    """
    # Static unroll over channels (C == 3): each 1/std is a compile-time scalar,
    # so the per-channel scale folds into the VPU multiply (no broadcast/gather).
    for c, s in enumerate(inv_std):
        p = jnp.clip(p_ref[c].astype(jnp.float32), -max_norm, max_norm) * s
        adv = x_ref[0, c].astype(jnp.float32) + p
        o_ref[0, c] = jnp.clip(adv, min_value, max_value).astype(o_ref.dtype)


def _largest_divisor_tile(dim, unit, cap):
    """Largest multiple of `unit` that divides `dim` and is <= cap.

    Falls back to the full extent when `dim` is not a multiple of `unit`
    (full-extent blocks are always layout-legal).
    """
    if dim % unit != 0:
        return dim
    cap = max(cap, unit)
    best = unit
    for t in range(unit, dim + 1, unit):
        if dim % t == 0 and t <= cap:
            best = t
    return best


def apply_perturbation_pallas(x, perturbation, *, max_norm, min_value, max_value,
                              target_tile_bytes=2 * 1024 * 1024):
    """x: (B, C, T, H, W); perturbation: (C, T, H, W) with C == 3."""
    B, C, T, H, W = x.shape
    assert perturbation.shape == (C, T, H, W)
    assert C == len(DEFAULT_STD)
    HW = H * W

    x2 = x.reshape(B, C, T, HW)
    p2 = perturbation.reshape(C, T, HW).astype(x.dtype)

    # VMEM-aware tile sizing: keep each (1, C, T_tile, HW_tile) slab <= ~2 MiB so
    # the 6 double-buffered tiles fit the default scoped VMEM on all generations.
    itemsize = np.dtype(x.dtype).itemsize
    row_bytes = C * itemsize
    hw_tile = _largest_divisor_tile(
        HW, 128, max(128, target_tile_bytes // max(1, row_bytes * T)))
    t_tile = _largest_divisor_tile(
        T, 8, max(8, target_tile_bytes // max(1, row_bytes * hw_tile)))
    n_hw = HW // hw_tile
    n_t = T // t_tile

    kernel = functools.partial(
        _perturb_kernel,
        inv_std=tuple(float(1.0 / s) for s in DEFAULT_STD),
        max_norm=float(max_norm),
        min_value=float(min_value),
        max_value=float(max_value),
    )

    out = pl.pallas_call(
        kernel,
        out_shape=jax.ShapeDtypeStruct((B, C, T, HW), x.dtype),
        # Batch is the innermost (fastest) axis: the perturbation block index is
        # constant across consecutive steps, so Pallas skips re-DMA-ing it.
        grid=(n_hw, n_t, B),
        in_specs=[
            pl.BlockSpec((1, C, t_tile, hw_tile), lambda hw, t, b: (b, 0, t, hw)),
            pl.BlockSpec((C, t_tile, hw_tile), lambda hw, t, b: (0, t, hw)),
        ],
        out_specs=pl.BlockSpec((1, C, t_tile, hw_tile), lambda hw, t, b: (b, 0, t, hw)),
        compiler_params=pltpu.CompilerParams(
            dimension_semantics=("parallel", "parallel", "parallel"),
            vmem_limit_bytes=32 * 1024 * 1024,
        ),
    )(x2, p2)

    return out.reshape(B, C, T, H, W)


class Perturbation:
    """JAX/Pallas port of the PyTorch Perturbation module (forward pass)."""

    def __init__(self, size, max_value=None, min_value=None, max_norm=1.0,
                 cyclic_pert=False, key=None):
        self.size = tuple(size)                         # (C, T, H, W)
        key = jax.random.PRNGKey(0) if key is None else key
        # torch.rand(size).mul(2).sub(1).mul(1e-6)  ->  U[-1e-6, 1e-6]
        self.perturbation = (
            (jax.random.uniform(key, self.size, dtype=jnp.float32) * 2.0 - 1.0) * 1e-6
        )
        if max_value is None:
            max_value = float(np.min((1.0 - np.array(DEFAULT_MEAN)) / np.array(DEFAULT_STD)))
        if min_value is None:
            min_value = float(np.max((0.0 - np.array(DEFAULT_MEAN)) / np.array(DEFAULT_STD)))
        self.max_value = max_value
        self.min_value = min_value
        self.max_norm = float(max_norm)
        self.dynamic_max_norm = float(max_norm)
        self.cyclic_pert = cyclic_pert

    def forward(self, inp):
        x, adversarial = inp
        if not adversarial:
            return x
        pert = self.perturbation
        if self.cyclic_pert:
            # torch.roll(pert_normalized, randint(0, T), dims=1): rolling the raw
            # perturbation over time is equivalent since clamp/normalize are
            # time-invariant elementwise ops.  Host RNG mirrors np.random usage
            # in the torch code (non-deterministic, not jit-traceable).
            # TODO(synk): in-kernel roll (pltpu.roll) if the shift must be traced.
            shift = int(np.random.randint(0, self.size[1]))
            pert = jnp.roll(pert, shift, axis=1)
        return apply_perturbation_pallas(
            x, pert,
            max_norm=self.dynamic_max_norm,
            min_value=self.min_value,
            max_value=self.max_value,
        )


def _reference_forward(x, pert, max_norm, min_value, max_value):
    """Plain-JAX reference used for a silent correctness check."""
    std = jnp.asarray(DEFAULT_STD, dtype=jnp.float32).reshape(1, 3, 1, 1, 1)
    p = jnp.clip(pert, -max_norm, max_norm)[None] / std
    return jnp.clip(x + p, min_value, max_value)


if __name__ == "__main__":
    B, C, T, H, W = 2, 3, 8, 16, 16
    key = jax.random.PRNGKey(0)
    kx, kp = jax.random.split(key)

    x = jax.random.normal(kx, (B, C, T, H, W), dtype=jnp.float32)
    model = Perturbation((C, T, H, W), key=kp, cyclic_pert=False)

    # adversarial path (Pallas kernel)
    y = model.forward((x, True))
    y = jax.block_until_ready(y)

    # non-adversarial path (identity, as in PyTorch)
    y_clean = jax.block_until_ready(model.forward((x, False)))
    assert y_clean.shape == x.shape

    # silent correctness check vs. plain-JAX reference
    y_ref = _reference_forward(x, model.perturbation, model.max_norm,
                               model.min_value, model.max_value)
    np.testing.assert_allclose(np.asarray(y), np.asarray(y_ref), rtol=1e-6, atol=1e-6)

    print("KERNEL_OK")
</pallas_src>

<mosaic_0001>
module attributes {stable_mosaic.version = 11 : i64} {
  func.func @_perturb_kernel(%arg0: i32, %arg1: i32, %arg2: i32, %arg3: memref<1x3x8x256xf32, #tpu.memory_space<vmem>>, %arg4: memref<3x8x256xf32, #tpu.memory_space<vmem>>, %arg5: memref<1x3x8x256xf32, #tpu.memory_space<vmem>>) attributes {dimension_semantics = [#tpu.dimension_semantics<parallel>, #tpu.dimension_semantics<parallel>, #tpu.dimension_semantics<parallel>], iteration_bounds = array<i64: 1, 1, 2>, scalar_prefetch = 0 : i64, scratch_operands = 0 : i64, tpu.core_type = #tpu.core_type<tc>, window_params = [{transform_indices = @transform_0, window_bounds = array<i64: 1, 3, 8, 256>}, {transform_indices = @transform_1, window_bounds = array<i64: 3, 8, 256>}, {transform_indices = @transform_2, window_bounds = array<i64: 1, 3, 8, 256>}]} {
    %c0 = arith.constant 0 : index
    %c0_0 = arith.constant 0 : index
    %c0_1 = arith.constant 0 : index
    %0 = vector.load %arg4[%c0, %c0_0, %c0_1] : memref<3x8x256xf32, #tpu.memory_space<vmem>>, vector<1x8x256xf32>
    %1 = vector.shape_cast %0 : vector<1x8x256xf32> to vector<8x256xf32>
    %cst = arith.constant -1.000000e+00 : f32
    %cst_2 = arith.constant 1.000000e+00 : f32
    %2 = vector.broadcast %cst : f32 to vector<8x256xf32>
    %3 = arith.maximumf %2, %1 : vector<8x256xf32>
    %4 = vector.broadcast %cst_2 : f32 to vector<8x256xf32>
    %5 = arith.minimumf %4, %3 : vector<8x256xf32>
    %cst_3 = arith.constant 4.3853879 : f32
    %6 = vector.broadcast %cst_3 : f32 to vector<8x256xf32>
    %7 = arith.mulf %5, %6 : vector<8x256xf32>
    %c0_4 = arith.constant 0 : index
    %c0_5 = arith.constant 0 : index
    %c0_6 = arith.constant 0 : index
    %c0_7 = arith.constant 0 : index
    %8 = vector.load %arg3[%c0_4, %c0_5, %c0_6, %c0_7] : memref<1x3x8x256xf32, #tpu.memory_space<vmem>>, vector<1x1x8x256xf32>
    %9 = vector.shape_cast %8 : vector<1x1x8x256xf32> to vector<8x256xf32>
    %10 = arith.addf %9, %7 : vector<8x256xf32>
    %cst_8 = arith.constant -1.73488057 : f32
    %cst_9 = arith.constant 2.49019861 : f32
    %11 = vector.broadcast %cst_8 : f32 to vector<8x256xf32>
    %12 = arith.maximumf %11, %10 : vector<8x256xf32>
    %13 = vector.broadcast %cst_9 : f32 to vector<8x256xf32>
    %14 = arith.minimumf %13, %12 : vector<8x256xf32>
    %c0_10 = arith.constant 0 : index
    %c0_11 = arith.constant 0 : index
    %c0_12 = arith.constant 0 : index
    %c0_13 = arith.constant 0 : index
    %15 = vector.load %arg5[%c0_10, %c0_11, %c0_12, %c0_13] : memref<1x3x8x256xf32, #tpu.memory_space<vmem>>, vector<1x1x8x256xf32>
    %16 = vector.shape_cast %15 : vector<1x1x8x256xf32> to vector<8x256xf32>
    %17 = vector.shape_cast %14 : vector<8x256xf32> to vector<1x1x8x256xf32>
    tpu.vector_store %arg5[%c0_10, %c0_11, %c0_12, %c0_13], %17 {strides = array<i32>} : memref<1x3x8x256xf32, #tpu.memory_space<vmem>>, vector<1x1x8x256xf32>,
    %c1 = arith.constant 1 : index
    %c0_14 = arith.constant 0 : index
    %c0_15 = arith.constant 0 : index
    %18 = vector.load %arg4[%c1, %c0_14, %c0_15] : memref<3x8x256xf32, #tpu.memory_space<vmem>>, vector<1x8x256xf32>
    %19 = vector.shape_cast %18 : vector<1x8x256xf32> to vector<8x256xf32>
    %cst_16 = arith.constant -1.000000e+00 : f32
    %cst_17 = arith.constant 1.000000e+00 : f32
    %20 = vector.broadcast %cst_16 : f32 to vector<8x256xf32>
    %21 = arith.maximumf %20, %19 : vector<8x256xf32>
    %22 = vector.broadcast %cst_17 : f32 to vector<8x256xf32>
    %23 = arith.minimumf %22, %21 : vector<8x256xf32>
    %cst_18 = arith.constant 4.51569223 : f32
    %24 = vector.broadcast %cst_18 : f32 to vector<8x256xf32>
    %25 = arith.mulf %23, %24 : vector<8x256xf32>
    %c0_19 = arith.constant 0 : index
    %c1_20 = arith.constant 1 : index
    %c0_21 = arith.constant 0 : index
    %c0_22 = arith.constant 0 : index
    %26 = vector.load %arg3[%c0_19, %c1_20, %c0_21, %c0_22] : memref<1x3x8x256xf32, #tpu.memory_space<vmem>>, vector<1x1x8x256xf32>
    %27 = vector.shape_cast %26 : vector<1x1x8x256xf32> to vector<8x256xf32>
    %28 = arith.addf %27, %25 : vector<8x256xf32>
    %cst_23 = arith.constant -1.73488057 : f32
    %cst_24 = arith.constant 2.49019861 : f32
    %29 = vector.broadcast %cst_23 : f32 to vector<8x256xf32>
    %30 = arith.maximumf %29, %28 : vector<8x256xf32>
    %31 = vector.broadcast %cst_24 : f32 to vector<8x256xf32>
    %32 = arith.minimumf %31, %30 : vector<8x256xf32>
    %c0_25 = arith.constant 0 : index
    %c1_26 = arith.constant 1 : index
    %c0_27 = arith.constant 0 : index
    %c0_28 = arith.constant 0 : index
    %33 = vector.load %arg5[%c0_25, %c1_26, %c0_27, %c0_28] : memref<1x3x8x256xf32, #tpu.memory_space<vmem>>, vector<1x1x8x256xf32>
    %34 = vector.shape_cast %33 : vector<1x1x8x256xf32> to vector<8x256xf32>
    %35 = vector.shape_cast %32 : vector<8x256xf32> to vector<1x1x8x256xf32>
    tpu.vector_store %arg5[%c0_25, %c1_26, %c0_27, %c0_28], %35 {strides = array<i32>} : memref<1x3x8x256xf32, #tpu.memory_space<vmem>>, vector<1x1x8x256xf32>,
    %c2 = arith.constant 2 : index
    %c0_29 = arith.constant 0 : index
    %c0_30 = arith.constant 0 : index
    %36 = vector.load %arg4[%c2, %c0_29, %c0_30] : memref<3x8x256xf32, #tpu.memory_space<vmem>>, vector<1x8x256xf32>
    %37 = vector.shape_cast %36 : vector<1x8x256xf32> to vector<8x256xf32>
    %cst_31 = arith.constant -1.000000e+00 : f32
    %cst_32 = arith.constant 1.000000e+00 : f32
    %38 = vector.broadcast %cst_31 : f32 to vector<8x256xf32>
    %39 = arith.maximumf %38, %37 : vector<8x256xf32>
    %40 = vector.broadcast %cst_32 : f32 to vector<8x256xf32>
    %41 = arith.minimumf %40, %39 : vector<8x256xf32>
    %cst_33 = arith.constant 4.60852861 : f32
    %42 = vector.broadcast %cst_33 : f32 to vector<8x256xf32>
    %43 = arith.mulf %41, %42 : vector<8x256xf32>
    %c0_34 = arith.constant 0 : index
    %c2_35 = arith.constant 2 : index
    %c0_36 = arith.constant 0 : index
    %c0_37 = arith.constant 0 : index
    %44 = vector.load %arg3[%c0_34, %c2_35, %c0_36, %c0_37] : memref<1x3x8x256xf32, #tpu.memory_space<vmem>>, vector<1x1x8x256xf32>
    %45 = vector.shape_cast %44 : vector<1x1x8x256xf32> to vector<8x256xf32>
    %46 = arith.addf %45, %43 : vector<8x256xf32>
    %cst_38 = arith.constant -1.73488057 : f32
    %cst_39 = arith.constant 2.49019861 : f32
    %47 = vector.broadcast %cst_38 : f32 to vector<8x256xf32>
    %48 = arith.maximumf %47, %46 : vector<8x256xf32>
    %49 = vector.broadcast %cst_39 : f32 to vector<8x256xf32>
    %50 = arith.minimumf %49, %48 : vector<8x256xf32>
    %c0_40 = arith.constant 0 : index
    %c2_41 = arith.constant 2 : index
    %c0_42 = arith.constant 0 : index
    %c0_43 = arith.constant 0 : index
    %51 = vector.load %arg5[%c0_40, %c2_41, %c0_42, %c0_43] : memref<1x3x8x256xf32, #tpu.memory_space<vmem>>, vector<1x1x8x256xf32>
    %52 = vector.shape_cast %51 : vector<1x1x8x256xf32> to vector<8x256xf32>
    %53 = vector.shape_cast %50 : vector<8x256xf32> to vector<1x1x8x256xf32>
    tpu.vector_store %arg5[%c0_40, %c2_41, %c0_42, %c0_43], %53 {strides = array<i32>} : memref<1x3x8x256xf32, #tpu.memory_space<vmem>>, vector<1x1x8x256xf32>,
    return
  }
  func.func @transform_0(%arg0: i32, %arg1: i32, %arg2: i32) -> (i32, i32, i32, i32) {
    %c0_i32 = arith.constant 0 : i32
    %c0_i32_0 = arith.constant 0 : i32
    return %arg2, %c0_i32, %arg1, %arg0 : i32, i32, i32, i32
  }
  func.func @transform_1(%arg0: i32, %arg1: i32, %arg2: i32) -> (i32, i32, i32) {
    %c0_i32 = arith.constant 0 : i32
    %c0_i32_0 = arith.constant 0 : i32
    return %c0_i32, %arg1, %arg0 : i32, i32, i32
  }
  func.func @transform_2(%arg0: i32, %arg1: i32, %arg2: i32) -> (i32, i32, i32, i32) {
    %c0_i32 = arith.constant 0 : i32
    %c0_i32_0 = arith.constant 0 : i32
    return %arg2, %c0_i32, %arg1, %arg0 : i32, i32, i32, i32
  }
}

</mosaic_0001>

<bundles_post_ra>
// kernel: tpu_custom_call.1
= control target key start
LH: loop header
LB: loop body
LE: loop exit
PB: predicated region body
PF: predicated region fallthrough
CT: control target
= control target key end

     0   :  { %7 = vsyncpa [#allocation3], 0  ;;  %s871_s0 = inlined_call_operand.hbm [shape: f32[2,3,8,256], index: 0, kind: input, shape index: {}]   ;;  %s872_s1 = inlined_call_operand.hbm [shape: f32[3,8,256], index: 1, kind: input, shape index: {}]   ;;  %s873_s2 = inlined_call_operand.hbm [shape: f32[2,3,8,256], index: 2, kind: output, shape index: {}]  }
   0x1   :  { %9 = vsyncpa [#allocation3 + $0x1], 0 }
   0x2   :  { %10 = vsyncpa [#allocation6], 0 }
   0x3   :  { %11 = vsyncpa [#allocation4], 0 }
   0x4   :  { %13 = vsyncpa [#allocation4 + $0x1], 0  ;;  %s678_s9 = smov 0   ;;  %s680_s10 = smov 0  }
   0x5   :  { %s682_s11 = smov 0   ;;  %s684_s12 = smov 0  }
   0x6   :  { %s686_s13 = smov 0   ;;  %s688_s14 = smov 0  }
   0x7 LB: > { %s410_s15 = sadd.s32 4294967295, %s654_s14   ;;  %s411_s16 = sadd.s32 4294967294, %s654_s14   ;;  %s654_s14 = sphi %s688_s14, %s19_s14   ;;  %s650_s13 = sphi %s686_s13, %s889_s13   ;;  %s646_s12 = sphi %s684_s12, %s888_s12   ;;  %s642_s11 = sphi %s682_s11, %s887_s11   ;;  %s638_s10 = sphi %s680_s10, %s886_s10   ;;  %s634_s9 = sphi %s678_s9, %s885_s9  }
   0x8   : > { %p62_p0 = scmp.ne.s32.totalorder %s638_s10, %s634_s9  ;;  %p712_p1 = scmp.eq.s32.totalorder %s410_s15, 0 }
   0x9   : > { %p716_p2 = scmp.eq.s32.totalorder %s410_s15, 1  ;;  %p124_p3 = scmp.eq.s32.totalorder %s411_s16, 1 }
   0xa   : > { %p722_p4 = por %p712_p1, %p62_p0  ;;  %p412_p5 = scmp.ge.s32.totalorder %s654_s14, 1 }
   0xb   : > { %p727_p6 = por %p124_p3, %p62_p0  ;;  %p131_p7 = scmp.lt.s32.totalorder %s654_s14, 3 }
   0xc   : > { %s877_s19 = scalar_select %p722_p4, 1, 0 }
   0xd   : > { %s878_s20 = scalar_select %p727_p6, 1, 0 }
   0xe   : > { %p732_p8 = pnand %p412_p5, %p131_p7  ;;  %s656_s22 = smov [#allocation5]  }
   0xf   : > { %s148_s23 = sshll.u32 %s656_s22, 4  ;;  %p414_p10 = scmp.ge.s32.totalorder %s654_s14, 2  ;;  %s149_s23 = int_to_ptr.vmem [resolvable:$true] %s148_s23 }
  0x10   : > { %p447_p9 = pneg %p732_p8  ;;  %s31_s25 = sadd.s32 1, %s650_s13 }
  0x11   : > { %s527_s26 = scalar_lea.vmem %s149_s23, 768  ;;  %p535_p5 = scmp.lt.s32.totalorder %s149_s23, %s149_s23 }
  0x12   : > { %p741_p11 = pnand %p447_p9, %p712_p1  ;;  %p528_p13 = scmp.ne.s32.totalorder %s149_s23, %s527_s26 }
  0x13   : > { %p536_p7 = scmp.lt.s32.totalorder %s527_s26, %s527_s26 }
  0x14   : > { %p518_p12 = pneg %p741_p11 }
  0x15   : > { %p537_p6 = por %p536_p7, %p535_p5 }
  0x16   : > { %p530_p0 = pnand %p528_p13, %p518_p12 }
  0x18   : > { %p531_p3 = pneg %p530_p0 }
  0x1a   : > { %p538_p4 = pnand %p537_p6, %p531_p3 }
  0x1c   : > { %541 = shalt.err (!%p538_p4)
}
  0x1d   : > { %s657_s27 = smov 256   ;;  %s658_s28 = smov 16  }
  0x1e   : > { %450 = dma.hbm_to_vmem [thread:$0]  (!%p741_p11), %s872_s1, 768, %s149_s23, [#allocation6], %s657_s27, %s657_s27, %s658_s28  }
  0x1f   : > { %p32_p4 = scmp.ge.s32.totalorder %s31_s25, 2  ;;  %s49_s3 = sadd.s32 1, %s642_s11 }
  0x20   : > { %p56_p6 = scmp.ne.s32.totalorder %s642_s11, %s638_s10  ;;  %p57_p9 = scmp.eq.s32.totalorder %s654_s14, 0 }
  0x21   : > { %s891_s25 = smov (%p32_p4, %s31_s25), 0  ;;  %p460_p0 = scmp.lt.s32.totalorder %s654_s14, 2 }
  0x22   : > { %p58_p12 = por %p57_p9, %p56_p6  ;;  %p764_p13 = por %p716_p2, %p56_p6 }
  0x23   : > { %s42_s5 = ssub.s32 %s650_s13, %s891_s25  ;;  %s162_s6 = sand.u32 1, %s642_s11  }
  0x24   : > { %p47_p3 = scmp.eq.s32.totalorder %s42_s5, 0  ;;  %s435_s7 = smul.u32 48, %s162_s6 }
  0x25   : > { %s436_s15 = smul.u32 768, %s650_s13  ;;  %p776_p11 = pnand %p460_p0, %p58_p12 }
  0x26   : > { %s773_s8 = scalar_select %p47_p3, %s642_s11, %s49_s3  }
  0x27   : > { %s166_s16 = scalar_lea.vmem [#allocation2], %s435_s7  ;;  %s176_s26 = scalar_lea.hbm %s871_s0, %s436_s15 }
  0x28   : > { %s177_s22 = sshll.u32 %s166_s16, 4  ;;  %s163_s29 = scalar_lea.sflag [#allocation3], %s162_s6  ;;  %s178_s22 = int_to_ptr.vmem [resolvable:$true] %s177_s22 }
  0x29   : > { %p544_p2 = pneg %p776_p11  ;;  %s555_s30 = scalar_lea.vmem %s178_s22, 768 }
  0x2a   : > { %p556_p5 = scmp.ne.s32.totalorder %s178_s22, %s555_s30  ;;  %s659_s3 = smov [#allocation2]  }
  0x2b   : > { %s560_s5 = sshll.u32 %s659_s3, 4  ;;  %s561_s5 = int_to_ptr.vmem [resolvable:$false] %s560_s5 }
  0x2c   : > { %p558_p7 = pnand %p556_p5, %p544_p2  ;;  %s562_s7 = scalar_lea.vmem %s561_s5, 1536 }
  0x2d   : > { %p563_p6 = scmp.lt.s32.totalorder %s178_s22, %s561_s5  ;;  %p564_p9 = scmp.lt.s32.totalorder %s562_s7, %s555_s30 }
  0x2e   : > { %p559_p4 = pneg %p558_p7 }
  0x2f   : > { %p565_p12 = por %p564_p9, %p563_p6 }
  0x31   : > { %p566_p0 = pnand %p565_p12, %p559_p4 }
  0x33   : > { %569 = shalt.err (!%p566_p0)
}
  0x34   : > { %454 = dma.hbm_to_vmem [thread:$0]  (!%p776_p11), %s176_s26, 768, %s178_s22, %s163_s29, %s657_s27, %s657_s27, %s658_s28  }
  0x35   : > { %189 = sbr.rel (%p732_p8) target bundleno = 91 (0x5b), region = 28  ;;  %s793_s6 = sand.u32 (!%p732_p8), 1, %s638_s10  }
  0x36   : > { %s437_s15 = smul.u32 (!%p732_p8), 48, %s793_s6  ;;  %s192_s16 = scalar_lea.sflag (!%p732_p8), [#allocation3], %s793_s6 }
  0x37   : > { %p883_p3 = scmp.ne.s32.totalorder (!%p732_p8), %s877_s19, 0 }
  0x38   : > { %s799_s24 = scalar_lea.vmem (!%p732_p8), [#allocation2], %s437_s15 }
  0x3a   : > { %621 = dma.done.wait (%p883_p3), %s192_s16, 768  }
  0x3b   : > { %623 = vsyncadd (%p883_p3), %s192_s16, 4294966528 }
  0x3c   : > { %625 = dma.done.wait (%p712_p1), [#allocation6], 768  }
  0x3d   : > { %627 = vsyncadd (%p712_p1), [#allocation6], 4294966528  ;;  %v223_v0 = vld [vmem:[#allocation5] sm:$0xff]  ;;  %v224_v1 = vld [vmem:[#allocation5 + $0x8] sm:$0xff]  ;;  %s219_s17 = scalar_lea.vmem [#allocation7], %s437_s15  ;;  %s438_s21 = smul.u32 768, %s646_s12 }
  0x3e   : > { %v418_v2 = vclamps-f32 %v223_v0, 1.0  ;;  %v231_v3 = vld [vmem:[%s799_s24] sm:$0xff]  ;;  %v419_v4 = vclamps-f32 %v224_v1, 1.0  ;;  %v232_v5 = vld [vmem:[%s799_s24 + $0x8] sm:$0xff]  ;;  %v422_v8 = vld [vmem:[%s799_s24 + $0x10] sm:$0xff]  ;;  %s301_s19 = sshll.u32 %s219_s17, 4  ;;  %s818_s19 = int_to_ptr.vmem [resolvable:$true] %s301_s19 }
  0x3f   : > { %v242_v6 = vld [vmem:[#allocation5 + $0x10] sm:$0xff]  ;;  %v243_v9 = vld [vmem:[#allocation5 + $0x18] sm:$0xff]  ;;  %v263_v10 = vld [vmem:[#allocation5 + $0x20] sm:$0xff]  ;;  %s823_s22 = scalar_lea.hbm %s873_s2, %s438_s21  ;;  %s284_s12 = scalar_lea.sflag [#allocation4], %s793_s6 }
  0x40   : > { %v420_v7 = vclamps-f32 %v242_v6, 1.0  ;;  %v229_v11 = vmul.f32 4.385388, %v418_v2  ;;  %v230_v12 = vmul.f32 4.385388, %v419_v4  ;;  %v421_v13 = vclamps-f32 %v243_v9, 1.0 }
  0x41   : > { %v426_v14 = vclamps-f32 %v263_v10, 1.0  ;;  %v423_v16 = vld [vmem:[%s799_s24 + $0x18] sm:$0xff]  ;;  %v428_v17 = vld [vmem:[%s799_s24 + $0x20] sm:$0xff]  ;;  %v429_v29 = vld [vmem:[%s799_s24 + $0x28] sm:$0xff]  ;;  %s570_s23 = scalar_lea.vmem %s818_s19, 768  ;;  %s660_s18 = smov [#allocation7]  }
  0x42   : > { %v248_v15 = vmul.f32 4.515692, %v420_v7  ;;  %v264_v18 = vld [vmem:[#allocation5 + $0x28] sm:$0xff]  ;;  %v233_v19 = vadd.f32 %v231_v3, %v229_v11  ;;  %v234_v20 = vadd.f32 %v232_v5, %v230_v12  ;;  %v249_v21 = vmul.f32 4.515692, %v421_v13  ;;  %p571_p1 = scmp.ne.s32.totalorder %s818_s19, %s570_s23  ;;  %s574_s26 = sshll.u32 %s660_s18, 4  ;;  %s575_s26 = int_to_ptr.vmem [resolvable:$false] %s574_s26 }
  0x43   : > { %v269_v22 = vmul.f32 4.6085286, %v426_v14  ;;  %v427_v24 = vclamps-f32 %v264_v18, 1.0  ;;  %s576_s29 = scalar_lea.vmem %s575_s26, 1536  ;;  %p577_p2 = scmp.lt.s32.totalorder %s818_s19, %s575_s26 }
  0x44   : > { %v253_v23 = vadd.f32 %v422_v8, %v248_v15  ;;  %v235_v25 = vmax.f32 %v233_v19, -1.7348806  ;;  %v236_v26 = vmax.f32 %v234_v20, -1.7348806  ;;  %v254_v27 = vadd.f32 %v423_v16, %v249_v21  ;;  %p572_p8 = pnand %p571_p1, %p764_p13  ;;  %p578_p5 = scmp.lt.s32.totalorder %s576_s29, %s570_s23 }
  0x45   : > { %v274_v28 = vadd.f32 %v428_v17, %v269_v22  ;;  %v270_v31 = vmul.f32 4.6085286, %v427_v24 }
  0x46   : > { %v255_v30 = vmax.f32 %v253_v23, -1.7348806  ;;  %v237_v32 = vmin.f32 %v235_v25, 2.4901986  ;;  %v238_v33 = vmin.f32 %v236_v26, 2.4901986  ;;  %p573_p11 = pneg %p572_p8  ;;  %p579_p7 = por %p578_p5, %p577_p2 }
  0x47   : > { %v256_v34 = vmax.f32 %v254_v27, -1.7348806  ;;  %v276_v36 = vmax.f32 %v274_v28, -1.7348806  ;;  %v275_v37 = vadd.f32 %v429_v29, %v270_v31 }
  0x48   : > { %v257_v35 = vmin.f32 %v255_v30, 2.4901986  ;;  %239 = vst [vmem:[%s219_s17] sm:$0xff] %v237_v32  ;;  %240 = vst [vmem:[%s219_s17 + $0x8] sm:$0xff] %v238_v33  ;;  %p580_p4 = pnand %p579_p7, %p573_p11 }
  0x49   : > { %v258_v38 = vmin.f32 %v256_v34, 2.4901986  ;;  %v278_v39 = vmin.f32 %v276_v36, 2.4901986  ;;  %v277_v40 = vmax.f32 %v275_v37, -1.7348806 }
  0x4a   : > { %424 = vst [vmem:[%s219_s17 + $0x10] sm:$0xff] %v257_v35 }
  0x4b   : > { %425 = vst [vmem:[%s219_s17 + $0x18] sm:$0xff] %v258_v38  ;;  %430 = vst [vmem:[%s219_s17 + $0x20] sm:$0xff] %v278_v39  ;;  %v279_v41 = vmin.f32 %v277_v40, 2.4901986 }
  0x4d   : > { %431 = vst [vmem:[%s219_s17 + $0x28] sm:$0xff] %v279_v41 }
  0x4e   : > { %583 = shalt.err (!%p580_p4)
}
  0x4f   : > { %s584_s30 = scalar_lea.hbm %s823_s22, 768  ;;  %s588_s7 = scalar_lea.hbm %s873_s2, 1536 }
  0x50   : > { %p585_p6 = scmp.ne.s32.totalorder %s823_s22, %s584_s30  ;;  %p589_p0 = scmp.lt.s32.totalorder %s823_s22, %s873_s2 }
  0x51   : > { %p590_p3 = scmp.lt.s32.totalorder %s588_s7, %s584_s30 }
  0x52   : > { %p586_p9 = pnand %p585_p6, %p764_p13 }
  0x53   : > { %p591_p1 = por %p590_p3, %p589_p0 }
  0x54   : > { %p587_p12 = pneg %p586_p9 }
  0x56   : > { %p592_p8 = pnand %p591_p1, %p587_p12 }
  0x58   : > { %595 = shalt.err (!%p592_p8)
}
  0x59   : > { %s661_s24 = smov 256   ;;  %s662_s17 = smov 16  }
  0x5a   : > { %445 = dma.vmem_to_hbm [thread:$0]  (%p764_p13), %s818_s19, 768, %s823_s22, %s284_s12, %s661_s24, %s661_s24, %s662_s17  }
  0x5b PF: > { %s316_s21 = sand.u32 1, %s634_s9   ;;  %p884_p11 = scmp.ne.s32.totalorder %s878_s20, 0 }
  0x5c   : > { %s317_s27 = scalar_lea.sflag [#allocation4], %s316_s21 }
  0x5d   : > { %p456_p2 = pnand %p414_p10, %p884_p11 }
  0x5f   : > { %p457_p5 = pneg %p456_p2 }
  0x61   : > { %629 = dma.done.wait (%p457_p5), %s317_s27, 768  }
  0x62   : > { %631 = vsyncadd (%p457_p5), %s317_s27, 4294966528  ;;  %s19_s14 = sadd.s32 1, %s654_s14   ;;  %s885_s9 = smov %s638_s10 }
  0x63   : > { %p16_p7 = scmp.ge.s32.totalorder %s19_s14, 4   ;;  %s886_s10 = smov %s642_s11 }
  0x64   : > { %s887_s11 = smov %s773_s8  ;;  %s888_s12 = smov %s650_s13 }
  0x65   : > { %s889_s13 = smov %s891_s25  ;;  %18 = sbr.rel (!%p16_p7) target bundleno = 7 (0x7), region = 84 }
  0x6a   :  { %322 = vsyncpa [#allocation3], 1 }
  0x6b   :  { %324 = vsyncpa [#allocation3 + $0x1], 1 }
  0x6c   :  { %325 = vsyncpa [#allocation6], 1 }
  0x6d   :  { %326 = vsyncpa [#allocation4], 1 }
  0x6e   :  { %328 = vsyncpa [#allocation4 + $0x1], 1 }

</bundles_post_ra>
